<compile_context>
chip_gen: v5e
topology: v5e:2x2
jax: 0.10.0
libtpu: 0.0.40
codegen_flags: <defaults>
</compile_context>

<pallas_src>
import math

import jax
import jax.numpy as jnp
from jax.experimental import pallas as pl
from jax.experimental.pallas import tpu as pltpu

# ----------------------------- config (small, consistent with the module) ---
B = 2              # batch
IN_CH = 3          # image channels fed to the backbone
H = W = 16         # spatial resolution of the backbone feature map
HW = H * W         # 256 -> lane axis
NUM_CHANNELS = 32  # backbone.num_channels
HIDDEN = 32        # transformer.d_model
NUM_CLASS = 16     # num_class


# ----------------------------- fused Pallas kernel ---------------------------
def _q2l_fused_kernel(x_ref, bbw_ref, bbb_ref, pw_ref, pb_ref, posT_ref,
                      q_ref, gW_ref, gb_ref, o_ref):
    # x:    (B, Cin, HW)  natural view of the NCHW input
    # bbw:  (NC, Cin)     backbone stand-in 1x1-conv weight (pre-transposed)
    # bbb:  (NC, 1)       backbone stand-in bias
    # pw:   (D, NC)       input_proj 1x1-conv weight (pre-transposed)
    # pb:   (D, 1)        input_proj bias
    # posT: (D, HW)       constant sinusoidal pos embedding (batch-shared)
    # q:    (C, D)        query_embed.weight
    # gW:   (C, D)        GroupWiseLinear W[0]
    # gb:   (1, C)        GroupWiseLinear b
    # o:    (B, C)        logits
    Bn, Cin, hw = x_ref.shape
    C, D = q_ref.shape
    inv_sqrt_d = 1.0 / math.sqrt(D)

    # One (2C, D) weight-stationary LHS: rows [0:C) scaled queries, rows
    # [C:2C) GroupWiseLinear weights -> memT feeds the MXU exactly once.
    lhs = jnp.concatenate([q_ref[...] * inv_sqrt_d, gW_ref[...]], axis=0)   # (2C, D)

    # Fold the batch into the lane axis (128-aligned concat): (Cin, B*HW).
    x_all = jnp.concatenate([x_ref[b] for b in range(Bn)], axis=-1)         # (Cin, B*HW)
    bias = pb_ref[...] + posT_ref[...]                                      # (D, HW)
    bias_all = jnp.concatenate([bias] * Bn, axis=-1)                        # (D, B*HW)

    # --- backbone stand-in: 1x1 conv + ReLU ----------------------------------
    # TODO(synk): backbone is an injected dependency of Qeruy2Label; this is a
    # deterministic 1x1-conv + ReLU stand-in producing (src, pos) like DETR.
    # Cin=3 << MXU tile, so unroll input channels as VPU outer-product adds.
    bbw = bbw_ref[...]
    src = sum(bbw[:, c:c + 1] * x_all[c:c + 1, :] for c in range(Cin))      # (NC, B*HW)
    src = jnp.maximum(src + bbb_ref[...], 0.0)

    # --- input_proj (1x1 conv) + bias + pos -> transformer memory (transposed)
    memT = jnp.dot(pw_ref[...], src,
                   preferred_element_type=jnp.float32) + bias_all           # (D, B*HW)

    # --- attention scores (rows 0:C) + GroupWiseLinear projections (rows C:2C)
    st = jnp.dot(lhs, memT, preferred_element_type=jnp.float32)             # (2C, B*HW)

    # --- transformer stand-in: per-batch softmax + fused GroupWiseLinear -----
    # TODO(synk): transformer is an injected dependency of Qeruy2Label; this is
    # a deterministic single cross-attention layer (softmax(QK^T/sqrt(d)) V).
    rows = []
    for b in range(Bn):                       # static unroll, 128-aligned slices
        s = st[:C, b * hw:(b + 1) * hw]                                     # (C, HW)
        t = st[C:, b * hw:(b + 1) * hw]                                     # (C, HW)
        m = jnp.max(s, axis=-1, keepdims=True)
        p = jnp.exp(s - m)
        p = p * pl.reciprocal(jnp.sum(p, axis=-1, keepdims=True), approx=True)
        # (W * (P @ mem)).sum(-1)  ==  (P * (W @ memT)).sum(-1)
        rows.append(jnp.sum(p * t, axis=-1)[None, :] + gb_ref[...])         # (1, C)
    o_ref[...] = jnp.concatenate(rows, axis=0).astype(o_ref.dtype)


@jax.jit
def query2label_forward(x_nchw, kp):
    """Whole post-backbone pipeline (plus backbone stand-in) in one pallas_call."""
    Bn, Cin, Hh, Ww = x_nchw.shape
    x3 = x_nchw.reshape(Bn, Cin, Hh * Ww)       # free view of contiguous NCHW
    vmem = pl.BlockSpec(memory_space=pltpu.MemorySpace.VMEM)
    # No grid: total resident footprint is < 100 KiB, so everything lives in
    # VMEM for a single invocation -> no per-step overhead, no pointless
    # double-buffering of constant blocks.
    return pl.pallas_call(
        _q2l_fused_kernel,
        out_shape=jax.ShapeDtypeStruct((Bn, NUM_CLASS), jnp.float32),
        in_specs=[vmem] * 9,
        out_specs=vmem,
    )(x3, kp["bb_wT"], kp["bb_b"], kp["proj_wT"], kp["proj_b"], kp["posT"],
      kp["query_embed"], kp["gwl_W0"], kp["gwl_b"])


# ----------------------------- init-time constants / packing -----------------
def make_pos_embed_T(Hh, Ww, D):
    # deterministic sinusoidal positional embedding (DETR-style stand-in),
    # batch-shared; returned transposed as (D, H*W) for the channel-major kernel.
    y = jnp.arange(Hh, dtype=jnp.float32)[:, None, None]
    x = jnp.arange(Ww, dtype=jnp.float32)[None, :, None]
    dims = jnp.arange(D, dtype=jnp.float32)[None, None, :]
    freq = 1.0 / (100.0 ** (dims / D))
    pos = jnp.sin(y * freq) + jnp.cos(x * freq)          # (H, W, D)
    return pos.reshape(Hh * Ww, D).T                     # (D, HW)


def init_params(key):
    ks = jax.random.split(key, 7)
    stdv = 1.0 / math.sqrt(HIDDEN)
    bound = 1.0 / math.sqrt(NUM_CHANNELS)
    return {
        # backbone stand-in (1x1 conv + ReLU)
        "bb_w": jax.random.normal(ks[0], (IN_CH, NUM_CHANNELS), jnp.float32) * 0.1,
        "bb_b": jax.random.normal(ks[1], (NUM_CHANNELS,), jnp.float32) * 0.01,
        # input_proj: nn.Conv2d(num_channels, hidden, kernel_size=1)
        "proj_w": jax.random.uniform(ks[2], (NUM_CHANNELS, HIDDEN), jnp.float32,
                                     minval=-bound, maxval=bound),
        "proj_b": jax.random.uniform(ks[3], (HIDDEN,), jnp.float32,
                                     minval=-bound, maxval=bound),
        # query_embed: nn.Embedding(num_class, hidden) — default N(0, 1)
        "query_embed": jax.random.normal(ks[4], (NUM_CLASS, HIDDEN), jnp.float32),
        # GroupWiseLinear: W (1, num_class, hidden), b (1, num_class)
        "gwl_W": jax.random.uniform(ks[5], (1, NUM_CLASS, HIDDEN), jnp.float32,
                                    minval=-stdv, maxval=stdv),
        "gwl_b": jax.random.uniform(ks[6], (1, NUM_CLASS), jnp.float32,
                                    minval=-stdv, maxval=stdv),
        # constant positional embedding, precomputed ONCE at init
        "posT": make_pos_embed_T(H, W, HIDDEN),          # (D, HW)
    }


def pack_for_kernel(params):
    """One-time (init-time) layout packing for the channel-major kernel."""
    return {
        "bb_wT": jnp.asarray(params["bb_w"].T),                 # (NC, Cin)
        "bb_b": params["bb_b"].reshape(NUM_CHANNELS, 1),        # (NC, 1)
        "proj_wT": jnp.asarray(params["proj_w"].T),             # (D, NC)
        "proj_b": params["proj_b"].reshape(HIDDEN, 1),          # (D, 1)
        "posT": params["posT"],                                 # (D, HW)
        "query_embed": params["query_embed"],                   # (C, D)
        "gwl_W0": params["gwl_W"][0],                           # (C, D)
        "gwl_b": params["gwl_b"],                               # (1, C)
    }


# ----------------------------- pure-JAX reference ----------------------------
def query2label_reference(x_nchw, params):
    xb = jnp.transpose(x_nchw, (0, 2, 3, 1))                    # NHWC
    src = jax.nn.relu(jnp.einsum("bhwc,cn->bhwn", xb, params["bb_w"])
                      + params["bb_b"])
    proj = jnp.einsum("bhwn,nd->bhwd", src, params["proj_w"]) + params["proj_b"]
    mem = proj.reshape(x_nchw.shape[0], H * W, HIDDEN) + params["posT"].T[None]
    q = params["query_embed"]                                   # (C, D)
    s = jnp.einsum("cd,bkd->bck", q, mem) / math.sqrt(HIDDEN)
    p = jax.nn.softmax(s, axis=-1)
    hs = jnp.einsum("bck,bkd->bcd", p, mem)                     # (B, C, D)
    return jnp.sum(hs * params["gwl_W"], axis=-1) + params["gwl_b"]


if __name__ == "__main__":
    key = jax.random.PRNGKey(0)
    k_in, k_par = jax.random.split(key)
    x = jax.random.normal(k_in, (B, IN_CH, H, W), jnp.float32)  # PyTorch NCHW input
    params = init_params(k_par)
    kparams = pack_for_kernel(params)        # once at init, not per forward

    out = jax.block_until_ready(query2label_forward(x, kparams))
    assert out.shape == (B, NUM_CLASS), out.shape

    ref = jax.block_until_ready(query2label_reference(x, params))
    assert bool(jnp.all(jnp.isfinite(out)))
    err = float(jnp.max(jnp.abs(out - ref)))
    assert bool(jnp.allclose(out, ref, rtol=2e-3, atol=2e-3)), err
    print("KERNEL_OK")
</pallas_src>

<mosaic_0001>
module attributes {stable_mosaic.version = 11 : i64} {
  func.func @_q2l_fused_kernel(%arg0: memref<2x3x256xf32, #tpu.memory_space<vmem>>, %arg1: memref<32x3xf32, #tpu.memory_space<vmem>>, %arg2: memref<32x1xf32, #tpu.memory_space<vmem>>, %arg3: memref<32x32xf32, #tpu.memory_space<vmem>>, %arg4: memref<32x1xf32, #tpu.memory_space<vmem>>, %arg5: memref<32x256xf32, #tpu.memory_space<vmem>>, %arg6: memref<16x32xf32, #tpu.memory_space<vmem>>, %arg7: memref<16x32xf32, #tpu.memory_space<vmem>>, %arg8: memref<1x16xf32, #tpu.memory_space<vmem>>, %arg9: memref<2x16xf32, #tpu.memory_space<vmem>>) attributes {dimension_semantics = [], scalar_prefetch = 0 : i64, scratch_operands = 0 : i64, tpu.core_type = #tpu.core_type<tc>} {
    %c0 = arith.constant 0 : index
    %c0_0 = arith.constant 0 : index
    %0 = vector.load %arg6[%c0, %c0_0] : memref<16x32xf32, #tpu.memory_space<vmem>>, vector<16x32xf32>
    %cst = arith.constant 0.176776692 : f32
    %1 = vector.broadcast %cst : f32 to vector<16x32xf32>
    %2 = arith.mulf %0, %1 : vector<16x32xf32>
    %c0_1 = arith.constant 0 : index
    %c0_2 = arith.constant 0 : index
    %3 = vector.load %arg7[%c0_1, %c0_2] : memref<16x32xf32, #tpu.memory_space<vmem>>, vector<16x32xf32>
    %4 = tpu.concatenate %2, %3 in 0 : vector<16x32xf32>, vector<16x32xf32> -> vector<32x32xf32>
    %c0_3 = arith.constant 0 : index
    %c0_4 = arith.constant 0 : index
    %c0_5 = arith.constant 0 : index
    %5 = vector.load %arg0[%c0_3, %c0_4, %c0_5] : memref<2x3x256xf32, #tpu.memory_space<vmem>>, vector<1x3x256xf32>
    %6 = vector.shape_cast %5 : vector<1x3x256xf32> to vector<3x256xf32>
    %c1 = arith.constant 1 : index
    %c0_6 = arith.constant 0 : index
    %c0_7 = arith.constant 0 : index
    %7 = vector.load %arg0[%c1, %c0_6, %c0_7] : memref<2x3x256xf32, #tpu.memory_space<vmem>>, vector<1x3x256xf32>
    %8 = vector.shape_cast %7 : vector<1x3x256xf32> to vector<3x256xf32>
    %9 = tpu.concatenate %6, %8 in 1 : vector<3x256xf32>, vector<3x256xf32> -> vector<3x512xf32>
    %c0_8 = arith.constant 0 : index
    %c0_9 = arith.constant 0 : index
    %10 = vector.load %arg4[%c0_8, %c0_9] : memref<32x1xf32, #tpu.memory_space<vmem>>, vector<32x1xf32>
    %c0_10 = arith.constant 0 : index
    %c0_11 = arith.constant 0 : index
    %11 = vector.load %arg5[%c0_10, %c0_11] : memref<32x256xf32, #tpu.memory_space<vmem>>, vector<32x256xf32>
    %12 = vector.broadcast %10 : vector<32x1xf32> to vector<32x256xf32>
    %13 = arith.addf %12, %11 : vector<32x256xf32>
    %14 = tpu.concatenate %13, %13 in 1 : vector<32x256xf32>, vector<32x256xf32> -> vector<32x512xf32>
    %c0_12 = arith.constant 0 : index
    %c0_13 = arith.constant 0 : index
    %15 = vector.load %arg1[%c0_12, %c0_13] : memref<32x3xf32, #tpu.memory_space<vmem>>, vector<32x3xf32>
    %16 = vector.extract_strided_slice %15 {offsets = [0, 0], sizes = [32, 1], strides = [1, 1]} : vector<32x3xf32> to vector<32x1xf32>
    %17 = vector.extract_strided_slice %9 {offsets = [0, 0], sizes = [1, 512], strides = [1, 1]} : vector<3x512xf32> to vector<1x512xf32>
    %18 = vector.broadcast %16 : vector<32x1xf32> to vector<32x512xf32>
    %19 = vector.broadcast %17 : vector<1x512xf32> to vector<32x512xf32>
    %20 = arith.mulf %18, %19 : vector<32x512xf32>
    %cst_14 = arith.constant 0.000000e+00 : f32
    %21 = vector.broadcast %cst_14 : f32 to vector<32x512xf32>
    %22 = arith.addf %21, %20 : vector<32x512xf32>
    %23 = vector.extract_strided_slice %15 {offsets = [0, 1], sizes = [32, 1], strides = [1, 1]} : vector<32x3xf32> to vector<32x1xf32>
    %24 = vector.extract_strided_slice %9 {offsets = [1, 0], sizes = [1, 512], strides = [1, 1]} : vector<3x512xf32> to vector<1x512xf32>
    %25 = vector.broadcast %23 : vector<32x1xf32> to vector<32x512xf32>
    %26 = vector.broadcast %24 : vector<1x512xf32> to vector<32x512xf32>
    %27 = arith.mulf %25, %26 : vector<32x512xf32>
    %28 = arith.addf %22, %27 : vector<32x512xf32>
    %29 = vector.extract_strided_slice %15 {offsets = [0, 2], sizes = [32, 1], strides = [1, 1]} : vector<32x3xf32> to vector<32x1xf32>
    %30 = vector.extract_strided_slice %9 {offsets = [2, 0], sizes = [1, 512], strides = [1, 1]} : vector<3x512xf32> to vector<1x512xf32>
    %31 = vector.broadcast %29 : vector<32x1xf32> to vector<32x512xf32>
    %32 = vector.broadcast %30 : vector<1x512xf32> to vector<32x512xf32>
    %33 = arith.mulf %31, %32 : vector<32x512xf32>
    %34 = arith.addf %28, %33 : vector<32x512xf32>
    %c0_15 = arith.constant 0 : index
    %c0_16 = arith.constant 0 : index
    %35 = vector.load %arg2[%c0_15, %c0_16] : memref<32x1xf32, #tpu.memory_space<vmem>>, vector<32x1xf32>
    %36 = vector.broadcast %35 : vector<32x1xf32> to vector<32x512xf32>
    %37 = arith.addf %34, %36 : vector<32x512xf32>
    %cst_17 = arith.constant 0.000000e+00 : f32
    %38 = vector.broadcast %cst_17 : f32 to vector<32x512xf32>
    %39 = arith.maximumf %37, %38 : vector<32x512xf32>
    %c0_18 = arith.constant 0 : index
    %c0_19 = arith.constant 0 : index
    %40 = vector.load %arg3[%c0_18, %c0_19] : memref<32x32xf32, #tpu.memory_space<vmem>>, vector<32x32xf32>
    %cst_20 = arith.constant dense<0.000000e+00> : vector<32x512xf32>
    %41 = tpu.matmul %40, %39, %cst_20 {dimension_numbers = #tpu.dot_dimension_numbers<[1], [0], [0], [1], [0, 0, 1, 1], [], []>} : vector<32x32xf32>, vector<32x512xf32>, vector<32x512xf32> -> vector<32x512xf32>
    %42 = arith.addf %41, %14 : vector<32x512xf32>
    %cst_21 = arith.constant dense<0.000000e+00> : vector<32x512xf32>
    %43 = tpu.matmul %4, %42, %cst_21 {dimension_numbers = #tpu.dot_dimension_numbers<[1], [0], [0], [1], [0, 0, 1, 1], [], []>} : vector<32x32xf32>, vector<32x512xf32>, vector<32x512xf32> -> vector<32x512xf32>
    %44 = vector.extract_strided_slice %43 {offsets = [0, 0], sizes = [16, 256], strides = [1, 1]} : vector<32x512xf32> to vector<16x256xf32>
    %45 = vector.extract_strided_slice %43 {offsets = [16, 0], sizes = [16, 256], strides = [1, 1]} : vector<32x512xf32> to vector<16x256xf32>
    %cst_22 = arith.constant dense<0xFF800000> : vector<16xf32>
    %46 = vector.multi_reduction <maximumf>, %44, %cst_22 [1] : vector<16x256xf32> to vector<16xf32>
    %47 = vector.shape_cast %46 : vector<16xf32> to vector<16x1xf32>
    %48 = vector.broadcast %47 : vector<16x1xf32> to vector<16x256xf32>
    %49 = arith.subf %44, %48 : vector<16x256xf32>
    %50 = math.exp %49 : vector<16x256xf32>
    %cst_23 = arith.constant dense<0.000000e+00> : vector<16xf32>
    %51 = vector.multi_reduction <add>, %50, %cst_23 [1] : vector<16x256xf32> to vector<16xf32>
    %52 = vector.shape_cast %51 : vector<16xf32> to vector<16x1xf32>
    %53 = tpu.reciprocal %52 {approx = true} : vector<16x1xf32> -> vector<16x1xf32>
    %54 = vector.broadcast %53 : vector<16x1xf32> to vector<16x256xf32>
    %55 = arith.mulf %50, %54 : vector<16x256xf32>
    %56 = arith.mulf %55, %45 : vector<16x256xf32>
    %cst_24 = arith.constant dense<0.000000e+00> : vector<16xf32>
    %57 = vector.multi_reduction <add>, %56, %cst_24 [1] : vector<16x256xf32> to vector<16xf32>
    %58 = vector.shape_cast %57 : vector<16xf32> to vector<1x16xf32>
    %c0_25 = arith.constant 0 : index
    %c0_26 = arith.constant 0 : index
    %59 = vector.load %arg8[%c0_25, %c0_26] : memref<1x16xf32, #tpu.memory_space<vmem>>, vector<1x16xf32>
    %60 = arith.addf %58, %59 : vector<1x16xf32>
    %61 = vector.extract_strided_slice %43 {offsets = [0, 256], sizes = [16, 256], strides = [1, 1]} : vector<32x512xf32> to vector<16x256xf32>
    %62 = vector.extract_strided_slice %43 {offsets = [16, 256], sizes = [16, 256], strides = [1, 1]} : vector<32x512xf32> to vector<16x256xf32>
    %cst_27 = arith.constant dense<0xFF800000> : vector<16xf32>
    %63 = vector.multi_reduction <maximumf>, %61, %cst_27 [1] : vector<16x256xf32> to vector<16xf32>
    %64 = vector.shape_cast %63 : vector<16xf32> to vector<16x1xf32>
    %65 = vector.broadcast %64 : vector<16x1xf32> to vector<16x256xf32>
    %66 = arith.subf %61, %65 : vector<16x256xf32>
    %67 = math.exp %66 : vector<16x256xf32>
    %cst_28 = arith.constant dense<0.000000e+00> : vector<16xf32>
    %68 = vector.multi_reduction <add>, %67, %cst_28 [1] : vector<16x256xf32> to vector<16xf32>
    %69 = vector.shape_cast %68 : vector<16xf32> to vector<16x1xf32>
    %70 = tpu.reciprocal %69 {approx = true} : vector<16x1xf32> -> vector<16x1xf32>
    %71 = vector.broadcast %70 : vector<16x1xf32> to vector<16x256xf32>
    %72 = arith.mulf %67, %71 : vector<16x256xf32>
    %73 = arith.mulf %72, %62 : vector<16x256xf32>
    %cst_29 = arith.constant dense<0.000000e+00> : vector<16xf32>
    %74 = vector.multi_reduction <add>, %73, %cst_29 [1] : vector<16x256xf32> to vector<16xf32>
    %75 = vector.shape_cast %74 : vector<16xf32> to vector<1x16xf32>
    %c0_30 = arith.constant 0 : index
    %c0_31 = arith.constant 0 : index
    %76 = vector.load %arg8[%c0_30, %c0_31] : memref<1x16xf32, #tpu.memory_space<vmem>>, vector<1x16xf32>
    %77 = arith.addf %75, %76 : vector<1x16xf32>
    %78 = tpu.concatenate %60, %77 in 0 : vector<1x16xf32>, vector<1x16xf32> -> vector<2x16xf32>
    %c0_32 = arith.constant 0 : index
    %c0_33 = arith.constant 0 : index
    %79 = vector.load %arg9[%c0_32, %c0_33] : memref<2x16xf32, #tpu.memory_space<vmem>>, vector<2x16xf32>
    tpu.vector_store %arg9[%c0_32, %c0_33], %78 {strides = array<i32>} : memref<2x16xf32, #tpu.memory_space<vmem>>, vector<2x16xf32>,
    return
  }
}

</mosaic_0001>

<bundles_post_ra>
// kernel: query2label_forward.1
= control target key start
LH: loop header
LB: loop body
LE: loop exit
PB: predicated region body
PF: predicated region fallthrough
CT: control target
= control target key end

     0   :  { %v825_v2 = vmov 1   ;;  %v826_v3 = vmov 0   ;;  %s1073_s0 = inlined_call_operand.vmem [shape: f32[2,3,256], index: 0, kind: input, shape index: {}]   ;;  %s1074_s1 = inlined_call_operand.vmem [shape: f32[32,3], index: 1, kind: input, shape index: {}]   ;;  %s1075_s2 = inlined_call_operand.vmem [shape: f32[32,1], index: 2, kind: input, shape index: {}]   ;;  %s1076_s3 = inlined_call_operand.vmem [shape: f32[32,32], index: 3, kind: input, shape index: {}]   ;;  %s1077_s4 = inlined_call_operand.vmem [shape: f32[32,1], index: 4, kind: input, shape index: {}]   ;;  %s1078_s5 = inlined_call_operand.vmem [shape: f32[32,256], index: 5, kind: input, shape index: {}]   ;;  %s1079_s6 = inlined_call_operand.vmem [shape: f32[16,32], index: 6, kind: input, shape index: {}]   ;;  %s1080_s7 = inlined_call_operand.vmem [shape: f32[16,32], index: 7, kind: input, shape index: {}]   ;;  %s1081_s8 = inlined_call_operand.vmem [shape: f32[1,16], index: 8, kind: input, shape index: {}]   ;;  %s1082_s9 = inlined_call_operand.hbm [shape: f32[2,16], index: 9, kind: output, shape index: {}]  }
   0x1   :  { %v97_v0 = vld [vmem:[%s1074_s1 + $0x18] sm:$0xff]  ;;  %v96_v1 = vld [vmem:[%s1074_s1 + $0x10] sm:$0xff]  ;;  %761 = vset.pattern.permute.xlu0 %v825_v2  ;;  %763 = vset.pattern.permute.xlu1 %v826_v3 }
   0x2   :  { %167 = vperm.xlu0 %761, %v97_v0   ;;  %110 = vperm.xlu1 %763, %v96_v1  }
   0x3   :  { %14 = vsyncpa [#allocation3], 0  ;;  %v827_v4 = vmov 2   ;;  %v95_v5 = vld [vmem:[%s1074_s1 + $0x8] sm:$0xff]  ;;  %v94_v6 = vld [vmem:[%s1074_s1] sm:$0xff]  ;;  %vm318_vm0 = vcmask 261120  }
   0x4   :  { %765 = vset.pattern.permute.xlu2 %v827_v4  ;;  %v260_v7 = vld [vmem:[%s1075_s2 + $0x10] sm:$0xff]  ;;  %v57_v8 = vld [vmem:[%s1077_s4 + $0x18] sm:$0xff]  ;;  %v54_v10 = vld [vmem:[%s1077_s4] sm:$0xff]  ;;  %vm689_vm1 = vcmask 130112   ;;  %vm704_vm2 = vcmask 1040384   ;;  %vm706_vm3 = vcmask 123904  }
   0x5   :  { %219 = vperm.xlu2 %765, %v97_v0   ;;  %v261_v9 = vld [vmem:[%s1075_s2 + $0x18] sm:$0xff]  ;;  %v259_v11 = vld [vmem:[%s1075_s2 + $0x8] sm:$0xff]  ;;  %v258_v12 = vld [vmem:[%s1075_s2] sm:$0xff] }
   0x6   :  { %v56_v13 = vld [vmem:[%s1077_s4 + $0x10] sm:$0xff]  ;;  %v55_v14 = vld [vmem:[%s1077_s4 + $0x8] sm:$0xff]  ;;  %v39_v15 = vld [vmem:[%s1073_s0] sm:$0x77] }
   0x7   :  { %43 = vst [vmem:[#allocation1] ss:$2 sm:$0xff] %v39_v15  ;;  %v724_v16 = vld [vmem:[%s1073_s0 + $0x8] sm:$0x77] }
   0xa   :  { %764 = vset.pattern.permute.xlu1 %v825_v2  ;;  %762 = vset.pattern.permute.xlu0 %v826_v3 }
   0xb   :  { %163 = vperm.xlu1 %764, %v96_v1   ;;  %115 = vperm.xlu0 %762, %v97_v0  }
   0xd   :  { %766 = vset.pattern.permute.xlu2 %v826_v3 }
   0xe   :  { %105 = vperm.xlu2 %766, %v95_v5   ;;  %v44_v17 = vld.sshfl [vmem:[#allocation1] sm:$0xff pattern:$0x75316420]  ;;  %v45_v18 = vld.sshfl [vmem:[#allocation1 + $0x8] sm:$0xff pattern:$0x75316420] }
   0xf   :  { %49 = vst [vmem:[#allocation1] ss:$2 sm:$0xff] %v724_v16  ;;  %v222_v28 = vperm.slane %v44_v17, 2  ;;  %v223_v29 = vperm.slane %v45_v18, 2  ;;  %v118_v33 = vperm.slane %v44_v17, 0  ;;  %v119_v34 = vperm.slane %v45_v18, 0 }
  0x10   :  { %v170_v35 = vperm.slane %v44_v17, 1  ;;  %v171_v36 = vperm.slane %v45_v18, 1 }
  0x13   :  { %159 = vperm.xlu1 %764, %v95_v5   ;;  %100 = vperm.xlu0 %762, %v94_v6  }
  0x16   :  { %767 = vset.pattern.permute.xlu2 %v827_v4  ;;  %v50_v25 = vld.sshfl [vmem:[#allocation1] sm:$0xff pattern:$0x75316420]  ;;  %v51_v26 = vld.sshfl [vmem:[#allocation1 + $0x8] sm:$0xff pattern:$0x75316420] }
  0x17   :  { %215 = vperm.xlu2 %767, %v96_v1   ;;  %v926_v31 = vperm.slane %v50_v25, 2  ;;  %v928_v32 = vperm.slane %v51_v26, 2  ;;  %v930_v37 = vperm.slane %v50_v25, 1  ;;  %v932_v38 = vperm.slane %v51_v26, 1 }
  0x18   :  { %v934_v39 = vperm.slane %v50_v25, 0  ;;  %v936_v40 = vperm.slane %v51_v26, 0 }
  0x1b   :  { %155 = vperm.xlu1 %764, %v94_v6   ;;  %274 = vperm.xlu0 %762, %v260_v7  }
  0x1f   :  { %211 = vperm.xlu2 %767, %v95_v5  }
  0x23   :  { %768 = vset.pattern.permute.xlu1 %v826_v3  ;;  %83 = vperm.xlu0 %762, %v57_v8  }
  0x24   :  { %279 = vperm.xlu1 %768, %v261_v9  }
  0x27   :  { %207 = vperm.xlu2 %767, %v94_v6  }
  0x2b   :  { %68 = vperm.xlu0 %762, %v54_v10  }
  0x2c   :  { %269 = vperm.xlu1 %768, %v259_v11  }
  0x2f   :  { %769 = vset.pattern.permute.xlu2 %v826_v3 }
  0x30   :  { %264 = vperm.xlu2 %769, %v258_v12  }
  0x34   :  { %78 = vperm.xlu1 %768, %v56_v13  }
  0x38   :  { %73 = vperm.xlu2 %769, %v55_v14  }
  0x5f   :  { %v220_v19 = vpop.permute.xlu2 %219 }
  0x60   :  { %v238_v42 = vmul.f32 %v222_v28, %v220_v19  ;;  %v239_v43 = vmul.f32 %v223_v29, %v220_v19  ;;  %v240_v46 = vmul.f32 %v926_v31, %v220_v19  ;;  %v241_v47 = vmul.f32 %v928_v32, %v220_v19 }
  0x68   :  { %v106_v20 = vpop.permute.xlu2 %105 }
  0x69   :  { %v938_v44 = vmul.f32 %v118_v33, %v106_v20  ;;  %v940_v45 = vmul.f32 %v119_v34, %v106_v20  ;;  %v128_v11 = vmul.f32 %v934_v39, %v106_v20  ;;  %v129_v12 = vmul.f32 %v936_v40, %v106_v20 }
  0x71   :  { %v216_v23 = vpop.permute.xlu2 %215 }
  0x72   :  { %v234_v48 = vmul.f32 %v222_v28, %v216_v23  ;;  %v235_v49 = vmul.f32 %v223_v29, %v216_v23  ;;  %v236_v50 = vmul.f32 %v926_v31, %v216_v23  ;;  %v237_v51 = vmul.f32 %v928_v32, %v216_v23 }
  0x74   :  { %v111_v21 = vpop.permute.xlu1 %110  ;;  %v168_v22 = vpop.permute.xlu0 %167 }
  0x75   :  { %v130_v56 = vmul.f32 %v118_v33, %v111_v21  ;;  %v131_v57 = vmul.f32 %v119_v34, %v111_v21  ;;  %v132_v58 = vmul.f32 %v934_v39, %v111_v21  ;;  %v133_v59 = vmul.f32 %v936_v40, %v111_v21 }
  0x76   :  { %v186_v61 = vmul.f32 %v170_v35, %v168_v22  ;;  %v187_v62 = vmul.f32 %v171_v36, %v168_v22  ;;  %v188_v63 = vmul.f32 %v930_v37, %v168_v22  ;;  %v189_v0 = vmul.f32 %v932_v38, %v168_v22 }
  0x79   :  { %v212_v30 = vpop.permute.xlu2 %211 }
  0x7a   :  { %v230_v13 = vmul.f32 %v222_v28, %v212_v30  ;;  %v956_v14 = vmul.f32 %v223_v29, %v212_v30  ;;  %v959_v16 = vmul.f32 %v926_v31, %v212_v30  ;;  %v962_v17 = vmul.f32 %v928_v32, %v212_v30 }
  0x7d   :  { %v164_v24 = vpop.permute.xlu1 %163  ;;  %v116_v27 = vpop.permute.xlu0 %115 }
  0x7e   :  { %v182_v52 = vmul.f32 %v170_v35, %v164_v24  ;;  %v183_v53 = vmul.f32 %v171_v36, %v164_v24  ;;  %v184_v54 = vmul.f32 %v930_v37, %v164_v24  ;;  %v185_v55 = vmul.f32 %v932_v38, %v164_v24 }
  0x7f   :  { %v134_v1 = vmul.f32 %v118_v33, %v116_v27  ;;  %v135_v2 = vmul.f32 %v119_v34, %v116_v27  ;;  %v136_v4 = vmul.f32 %v934_v39, %v116_v27  ;;  %v137_v5 = vmul.f32 %v936_v40, %v116_v27 }
  0x80   :  { %v198_v7 = vadd.f32 %v182_v52, %v130_v56  ;;  %v199_v8 = vadd.f32 %v183_v53, %v131_v57  ;;  %v200_v9 = vadd.f32 %v184_v54, %v132_v58  ;;  %v201_v10 = vadd.f32 %v185_v55, %v133_v59 }
  0x81   :  { %v208_v6 = vpop.permute.xlu2 %207  ;;  %v202_v21 = vadd.f32 %v186_v61, %v134_v1  ;;  %v203_v22 = vadd.f32 %v187_v62, %v135_v2  ;;  %v204_v23 = vadd.f32 %v188_v63, %v136_v4  ;;  %v205_v24 = vadd.f32 %v189_v0, %v137_v5 }
  0x82   :  { %v226_v18 = vmul.f32 %v222_v28, %v208_v6  ;;  %v227_v19 = vmul.f32 %v223_v29, %v208_v6  ;;  %v250_v25 = vadd.f32 %v234_v48, %v198_v7  ;;  %v251_v26 = vadd.f32 %v235_v49, %v199_v8 }
  0x83   :  { %v252_v27 = vadd.f32 %v236_v50, %v200_v9  ;;  %v253_v20 = vadd.f32 %v237_v51, %v201_v10  ;;  %v254_v29 = vadd.f32 %v238_v42, %v202_v21  ;;  %v255_v59 = vadd.f32 %v239_v43, %v203_v22 }
  0x84   :  { %v256_v61 = vadd.f32 %v240_v46, %v204_v23  ;;  %v257_v62 = vadd.f32 %v241_v47, %v205_v24  ;;  %v229_v7 = vmul.f32 %v928_v32, %v208_v6 }
  0x85   :  { %v160_v41 = vpop.permute.xlu1 %159  ;;  %v101_v60 = vpop.permute.xlu0 %100 }
  0x86   :  { %v178_v52 = vmul.f32 %v170_v35, %v160_v41  ;;  %v179_v53 = vmul.f32 %v171_v36, %v160_v41  ;;  %v180_v54 = vmul.f32 %v930_v37, %v160_v41  ;;  %v181_v55 = vmul.f32 %v932_v38, %v160_v41 }
  0x87   :  { %v122_v56 = vmul.f32 %v118_v33, %v101_v60  ;;  %v123_v57 = vmul.f32 %v119_v34, %v101_v60  ;;  %v124_v48 = vmul.f32 %v934_v39, %v101_v60  ;;  %v125_v49 = vmul.f32 %v936_v40, %v101_v60 }
  0x88   :  { %v194_v63 = vadd.f32 %v178_v52, %v938_v44  ;;  %v195_v33 = vadd.f32 %v179_v53, %v940_v45  ;;  %v196_v34 = vadd.f32 %v180_v54, %v128_v11  ;;  %v228_v45 = vmul.f32 %v926_v31, %v208_v6 }
  0x8a   :  { %v265_v10 = vpop.permute.xlu2 %264  ;;  %v247_v31 = vadd.f32 %v956_v14, %v195_v33  ;;  %v248_v32 = vadd.f32 %v959_v16, %v196_v34 }
  0x8d   :  { %v156_v15 = vpop.permute.xlu1 %155  ;;  %v275_v28 = vpop.permute.xlu0 %274 }
  0x8e   :  { %v174_v30 = vmul.f32 %v170_v35, %v156_v15  ;;  %v175_v58 = vmul.f32 %v171_v36, %v156_v15  ;;  %v176_v50 = vmul.f32 %v930_v37, %v156_v15  ;;  %v177_v51 = vmul.f32 %v932_v38, %v156_v15 }
  0x8f   :  { %v197_v35 = vadd.f32 %v181_v55, %v129_v12  ;;  %v290_v41 = vadd.f32 %v275_v28, %v250_v25  ;;  %v291_v42 = vadd.f32 %v275_v28, %v251_v26  ;;  %v292_v40 = vadd.f32 %v275_v28, %v252_v27 }
  0x90   :  { %v190_v43 = vadd.f32 %v174_v30, %v122_v56  ;;  %v191_v46 = vadd.f32 %v175_v58, %v123_v57  ;;  %v293_v60 = vadd.f32 %v275_v28, %v253_v20  ;;  %v192_v37 = vadd.f32 %v176_v50, %v124_v48  ;;  %v314_v58 = vld [vmem:[%s1076_s3] sm:$0xff]  ;;  %v315_v28 = vld [vmem:[%s1076_s3 + $0x8] sm:$0xff] }
  0x91   :  { %v193_v2 = vadd.f32 %v177_v51, %v125_v49  ;;  %v306_v11 = vmax.f32 %v290_v41, 0.0  ;;  %v307_v12 = vmax.f32 %v291_v42, 0.0  ;;  %v246_v15 = vadd.f32 %v230_v13, %v194_v63  ;;  %v64_v41 = vld [vmem:[%s1078_s5 + $0x30] sm:$0xff]  ;;  %v65_v42 = vld [vmem:[%s1078_s5 + $0x38] sm:$0xff] }
  0x92   :  { %v242_v8 = vadd.f32 %v226_v18, %v190_v43  ;;  %v243_v9 = vadd.f32 %v227_v19, %v191_v46  ;;  %v308_v21 = vmax.f32 %v292_v40, 0.0  ;;  %v309_v22 = vmax.f32 %v293_v60, 0.0  ;;  %v74_v43 = vpop.permute.xlu2 %73  ;;  %v62_v46 = vld [vmem:[%s1078_s5 + $0x20] sm:$0xff]  ;;  %v60_v40 = vld [vmem:[%s1078_s5 + $0x10] sm:$0xff] }
  0x93   :  { %v244_v23 = vadd.f32 %v228_v45, %v192_v37  ;;  %v245_v24 = vadd.f32 %v229_v7, %v193_v2  ;;  %v249_v6 = vadd.f32 %v962_v17, %v197_v35  ;;  %v61_v2 = vld [vmem:[%s1078_s5 + $0x18] sm:$0xff] }
  0x94   :  { %v282_v19 = vadd.f32 %v265_v10, %v242_v8  ;;  %v283_v25 = vadd.f32 %v265_v10, %v243_v9 }
  0x95   :  { %v284_v52 = vadd.f32 %v265_v10, %v244_v23  ;;  %v285_v53 = vadd.f32 %v265_v10, %v245_v24  ;;  %v84_v63 = vpop.permute.xlu0 %83  ;;  %v59_v10 = vld [vmem:[%s1078_s5 + $0x8] sm:$0xff]  ;;  %v33_v23 = vld [vmem:[%s1079_s6] sm:$0xff] }
  0x96   :  { %v280_v36 = vpop.permute.xlu1 %279  ;;  %v298_v14 = vmax.f32 %v282_v19, 0.0  ;;  %v299_v16 = vmax.f32 %v283_v25, 0.0 }
  0x97   :  { %v294_v47 = vadd.f32 %v280_v36, %v254_v29  ;;  %v295_v0 = vadd.f32 %v280_v36, %v255_v59  ;;  %v296_v39 = vadd.f32 %v280_v36, %v256_v61  ;;  %v297_v1 = vadd.f32 %v280_v36, %v257_v62  ;;  %v316_v29 = vld [vmem:[%s1076_s3 + $0x10] sm:$0xff]  ;;  %v317_v59 = vld [vmem:[%s1076_s3 + $0x18] sm:$0xff]  ;;  %s715_s3 = sshll.u32 %s1082_s9, 4  ;;  %s716_s3 = int_to_ptr.hbm [resolvable:$true] %s715_s3 }
  0x98   :  { %v300_v17 = vmax.f32 %v284_v52, 0.0  ;;  %v301_v30 = vmax.f32 %v285_v53, 0.0 }
  0x99   :  { %v310_v38 = vmax.f32 %v294_v47, 0.0  ;;  %v311_v4 = vmax.f32 %v295_v0, 0.0  ;;  %v312_v44 = vmax.f32 %v296_v39, 0.0  ;;  %v313_v5 = vmax.f32 %v297_v1, 0.0  ;;  %v63_v47 = vld [vmem:[%s1078_s5 + $0x28] sm:$0xff] }
  0x9a   :  { %v92_v39 = vadd.f32 %v84_v63, %v64_v41  ;;  %v93_v1 = vadd.f32 %v84_v63, %v65_v42  ;;  %v38_v63 = vld [vmem:[%s1080_s7 + $0x8] sm:$0xff]  ;;  %v618_v42 = vlaneseq }
  0x9b   :  { %343 = vmatpush.msra.mxu0 %v310_v38  ;;  %372 = vmatpush.msra.mxu1 %v311_v4 }
  0x9c   :  { %401 = vmatpush.msra.mxu2 %v312_v44  ;;  %430 = vmatpush.msra.mxu3 %v313_v5  ;;  %v58_v44 = vld [vmem:[%s1078_s5] sm:$0xff] }
  0x9d   :  { %344 = vmatpush.msra.mxu0 %v306_v11  ;;  %373 = vmatpush.msra.mxu1 %v307_v12  ;;  %v69_v5 = vpop.permute.xlu0 %68  ;;  %v88_v11 = vadd.f32 %v74_v43, %v60_v40  ;;  %v89_v12 = vadd.f32 %v74_v43, %v61_v2  ;;  %v619_v43 = vshrl.u32 %v618_v42, 7 }
  0x9e   :  { %402 = vmatpush.msra.mxu2 %v308_v21  ;;  %431 = vmatpush.msra.mxu3 %v309_v22  ;;  %v270_v18 = vpop.permute.xlu1 %269  ;;  %v86_v22 = vadd.f32 %v69_v5, %v58_v44  ;;  %v87_v24 = vadd.f32 %v69_v5, %v59_v10 }
  0x9f   :  { %v286_v13 = vadd.f32 %v270_v18, %v246_v15  ;;  %v287_v26 = vadd.f32 %v270_v18, %v247_v31  ;;  %v288_v27 = vadd.f32 %v270_v18, %v248_v32  ;;  %v289_v20 = vadd.f32 %v270_v18, %v249_v6  ;;  %770 = vset.pattern.permute.xlu0 %v619_v43 }
  0xa1   :  { %v302_v54 = vmax.f32 %v286_v13, 0.0  ;;  %v303_v55 = vmax.f32 %v287_v26, 0.0  ;;  %v304_v56 = vmax.f32 %v288_v27, 0.0  ;;  %v305_v57 = vmax.f32 %v289_v20, 0.0 }
  0xa2   :  { %v35_v13 = vmul.f32 0.17677669, %v33_v23 }
  0xa3   :  { %345 = vmatpush.msra.mxu0 %v302_v54  ;;  %374 = vmatpush.msra.mxu1 %v303_v55  ;;  %v34_v55 = vld [vmem:[%s1079_s6 + $0x8] sm:$0xff] }
  0xa4   :  { %403 = vmatpush.msra.mxu2 %v304_v56  ;;  %432 = vmatpush.msra.mxu3 %v305_v57 }
  0xa5   :  { %346 = vmatpush.msra.mxu0 %v298_v14  ;;  %375 = vmatpush.msra.mxu1 %v299_v16  ;;  %v36_v14 = vmul.f32 0.17677669, %v34_v55 }
  0xa6   :  { %404 = vmatpush.msra.mxu2 %v300_v17  ;;  %433 = vmatpush.msra.mxu3 %v301_v30  ;;  %v79_v0 = vpop.permute.xlu1 %78 }
  0xa7   :  { %725 = vmatmul.msk.f32.vlgmr.msra.gmra.mxu0 %vm318_vm0, %v314_v58  ;;  %729 = vmatmul.msk.f32.vlgmr.msra.gmra.mxu1 %vm318_vm0, %v314_v58  ;;  %v90_v45 = vadd.f32 %v79_v0, %v62_v46  ;;  %v91_v7 = vadd.f32 %v79_v0, %v63_v47  ;;  %v626_v46 = vadd.s32 8, %v619_v43 }
  0xa8   :  { %733 = vmatmul.msk.f32.vlgmr.msra.gmra.mxu2 %vm318_vm0, %v314_v58  ;;  %737 = vmatmul.msk.f32.vlgmr.msra.gmra.mxu3 %vm318_vm0, %v314_v58 }
  0xa9   :  { %771 = vset.pattern.permute.xlu1 %v626_v46 }
  0xaf   :  { %726 = vmatmul.msk.f32.gmra.mxu0 %vm318_vm0, %v315_v28  ;;  %730 = vmatmul.msk.f32.gmra.mxu1 %vm318_vm0, %v315_v28 }
  0xb0   :  { %734 = vmatmul.msk.f32.gmra.mxu2 %vm318_vm0, %v315_v28  ;;  %738 = vmatmul.msk.f32.gmra.mxu3 %vm318_vm0, %v315_v28 }
  0xb7   :  { %727 = vmatmul.msk.f32.gmra.mxu0 %vm318_vm0, %v316_v29  ;;  %731 = vmatmul.msk.f32.gmra.mxu1 %vm318_vm0, %v316_v29 }
  0xb8   :  { %735 = vmatmul.msk.f32.gmra.mxu2 %vm318_vm0, %v316_v29  ;;  %739 = vmatmul.msk.f32.gmra.mxu3 %vm318_vm0, %v316_v29 }
  0xbf   :  { %728 = vmatmul.msk.f32.gmra.mxu0 %vm318_vm0, %v317_v59  ;;  %732 = vmatmul.msk.f32.gmra.mxu1 %vm318_vm0, %v317_v59 }
  0xc0   :  { %736 = vmatmul.msk.f32.gmra.mxu2 %vm318_vm0, %v317_v59  ;;  %740 = vmatmul.msk.f32.gmra.mxu3 %vm318_vm0, %v317_v59 }
 0x124   :  { %v348_v61 = vpop.f32.mrf.mxu0  ;;  %v377_v62 = vpop.f32.mrf.mxu1 }
 0x125   :  { %v349_v6 = vadd.f32 %v348_v61, %v86_v22  ;;  %v378_v18 = vadd.f32 %v377_v62, %v87_v24 }
 0x12b   :  { %v1005_v48 = vpop.f32.mrf.mxu2  ;;  %v1007_v49 = vpop.f32.mrf.mxu3 }
 0x12c   :  { %v351_v50 = vpop.f32.mrf.mxu0  ;;  %v380_v51 = vpop.f32.mrf.mxu1  ;;  %v407_v56 = vadd.f32 %v1005_v48, %v86_v22  ;;  %v436_v57 = vadd.f32 %v1007_v49, %v87_v24 }
 0x12d   :  { %v352_v31 = vadd.f32 %v351_v50, %v88_v11  ;;  %v381_v32 = vadd.f32 %v380_v51, %v89_v12  ;;  %v37_v51 = vld [vmem:[%s1080_s7] sm:$0xff] }
 0x133   :  { %v409_v33 = vpop.f32.mrf.mxu2  ;;  %v438_v34 = vpop.f32.mrf.mxu3 }
 0x134   :  { %v354_v35 = vpop.f32.mrf.mxu0  ;;  %v383_v36 = vpop.f32.mrf.mxu1  ;;  %v410_v53 = vadd.f32 %v409_v33, %v88_v11  ;;  %v439_v54 = vadd.f32 %v438_v34, %v89_v12 }
 0x135   :  { %v355_v15 = vadd.f32 %v354_v35, %v90_v45  ;;  %v384_v21 = vadd.f32 %v383_v36, %v91_v7 }
 0x13b   :  { %v412_v60 = vpop.f32.mrf.mxu2  ;;  %v441_v37 = vpop.f32.mrf.mxu3 }
 0x13c   :  { %v357_v38 = vpop.f32.mrf.mxu0  ;;  %v386_v4 = vpop.f32.mrf.mxu1  ;;  %v413_v20 = vadd.f32 %v412_v60, %v90_v45  ;;  %v442_v52 = vadd.f32 %v441_v37, %v91_v7 }
 0x13d   :  { %v358_v8 = vadd.f32 %v357_v38, %v92_v39  ;;  %v387_v9 = vadd.f32 %v386_v4, %v93_v1 }
 0x13f   :  { %471 = vmatpush.msrb.mxu0 %v358_v8  ;;  %500 = vmatpush.msrb.mxu1 %v387_v9 }
 0x141   :  { %472 = vmatpush.msrb.mxu0 %v355_v15  ;;  %501 = vmatpush.msrb.mxu1 %v384_v21 }
 0x143   :  { %v415_v19 = vpop.f32.mrf.mxu2  ;;  %v444_v25 = vpop.f32.mrf.mxu3  ;;  %473 = vmatpush.msrb.mxu0 %v352_v31  ;;  %502 = vmatpush.msrb.mxu1 %v381_v32 }
 0x144   :  { %v416_v26 = vadd.f32 %v415_v19, %v92_v39  ;;  %v445_v27 = vadd.f32 %v444_v25, %v93_v1 }
 0x145   :  { %474 = vmatpush.msrb.mxu0 %v349_v6  ;;  %503 = vmatpush.msrb.mxu1 %v378_v18  ;;  %v774_v18 = vld [vmem:[%s1081_s8] ss:$0 sm:$0xff]  ;;  %s828_s8 = smov [#allocation2]  }
 0x146   :  { %529 = vmatpush.msrb.mxu2 %v416_v26  ;;  %558 = vmatpush.msrb.mxu3 %v445_v27  ;;  %s713_s17 = sshll.u32 %s828_s8, 4  ;;  %s714_s17 = int_to_ptr.vmem [resolvable:$true] %s713_s17 }
 0x147   :  { %741 = vmatmul.msk.f32.vlgmr.msrb.gmra.mxu0 %vm318_vm0, %v35_v13  ;;  %745 = vmatmul.msk.f32.vlgmr.msrb.gmra.mxu1 %vm318_vm0, %v35_v13 }
 0x148   :  { %530 = vmatpush.msrb.mxu2 %v413_v20  ;;  %559 = vmatpush.msrb.mxu3 %v442_v52 }
 0x14a   :  { %531 = vmatpush.msrb.mxu2 %v410_v53  ;;  %560 = vmatpush.msrb.mxu3 %v439_v54 }
 0x14c   :  { %532 = vmatpush.msrb.mxu2 %v407_v56  ;;  %561 = vmatpush.msrb.mxu3 %v436_v57 }
 0x14d   :  { %749 = vmatmul.msk.f32.vlgmr.msrb.gmra.mxu2 %vm318_vm0, %v35_v13  ;;  %753 = vmatmul.msk.f32.vlgmr.msrb.gmra.mxu3 %vm318_vm0, %v35_v13 }
 0x14f   :  { %742 = vmatmul.msk.f32.gmra.mxu0 %vm318_vm0, %v36_v14  ;;  %746 = vmatmul.msk.f32.gmra.mxu1 %vm318_vm0, %v36_v14 }
 0x155   :  { %750 = vmatmul.msk.f32.gmra.mxu2 %vm318_vm0, %v36_v14  ;;  %754 = vmatmul.msk.f32.gmra.mxu3 %vm318_vm0, %v36_v14 }
 0x157   :  { %743 = vmatmul.msk.f32.gmra.mxu0 %vm318_vm0, %v37_v51  ;;  %747 = vmatmul.msk.f32.gmra.mxu1 %vm318_vm0, %v37_v51 }
 0x15d   :  { %751 = vmatmul.msk.f32.gmra.mxu2 %vm318_vm0, %v37_v51  ;;  %755 = vmatmul.msk.f32.gmra.mxu3 %vm318_vm0, %v37_v51 }
 0x15f   :  { %744 = vmatmul.msk.f32.gmra.mxu0 %vm318_vm0, %v38_v63  ;;  %748 = vmatmul.msk.f32.gmra.mxu1 %vm318_vm0, %v38_v63 }
 0x165   :  { %752 = vmatmul.msk.f32.gmra.mxu2 %vm318_vm0, %v38_v63  ;;  %756 = vmatmul.msk.f32.gmra.mxu3 %vm318_vm0, %v38_v63 }
 0x1c4   :  { %v476_v16 = vpop.f32.mrf.mxu0  ;;  %v505_v17 = vpop.f32.mrf.mxu1 }
 0x1c5   :  { %v575_v30 = vmax.f32 %v476_v16, %v505_v17 }
 0x1c7   :  { %576 = vmax.xlane.f32.xlu1 %v575_v30 }
 0x1cc   :  { %v479_v58 = vpop.f32.mrf.mxu0  ;;  %v508_v28 = vpop.f32.mrf.mxu1 }
 0x1cd   :  { %v578_v29 = vmax.f32 %v479_v58, %v508_v28 }
 0x1cf   :  { %579 = vmax.xlane.f32.xlu2 %v578_v29 }
 0x1d0   :  { %v534_v59 = vpop.f32.mrf.mxu2  ;;  %v563_v61 = vpop.f32.mrf.mxu3 }
 0x1d1   :  { %v634_v62 = vmax.f32 %v534_v59, %v563_v61 }
 0x1d3   :  { %635 = vmax.xlane.f32.xlu0 %v634_v62 }
 0x1d4   :  { %v482_v25 = vpop.f32.mrf.mxu0  ;;  %v511_v13 = vpop.f32.mrf.mxu1 }
 0x1d8   :  { %v537_v48 = vpop.f32.mrf.mxu2  ;;  %v566_v49 = vpop.f32.mrf.mxu3 }
 0x1d9   :  { %v637_v50 = vmax.f32 %v537_v48, %v566_v49 }
 0x1db   :  { %638 = vmax.xlane.f32.xlu2 %v637_v50 }
 0x1dc   :  { %v485_v14 = vpop.f32.mrf.mxu0 }
 0x23a   :  { %v577_v33 = vpop.xlane.xlu1 %576 }
 0x23b   :  { %v581_v34 = vsub.f32 %v476_v16, %v577_v33  ;;  %v582_v35 = vsub.f32 %v505_v17, %v577_v33  ;;  %v514_v16 = vpop.f32.mrf.mxu1 }
 0x23d   :  { %v585_v36 = vmul.f32 1.442695, %v581_v34  ;;  %v587_v41 = vmul.f32 1.442695, %v582_v35 }
 0x23f   :  { %775 = vpow2.f32 %v585_v36 }
 0x240   :  { %777 = vpow2.f32 %v587_v41 }
 0x242   :  { %v580_v47 = vpop.xlane.xlu2 %579 }
 0x243   :  { %v583_v0 = vsub.f32 %v479_v58, %v580_v47  ;;  %v584_v39 = vsub.f32 %v508_v28, %v580_v47  ;;  %v540_v58 = vpop.f32.mrf.mxu2  ;;  %v569_v28 = vpop.f32.mrf.mxu3 }
 0x245   :  { %v776_v1 = vpop.eup %775  ;;  %v589_v40 = vmul.f32 1.442695, %v583_v0  ;;  %v591_v60 = vmul.f32 1.442695, %v584_v39 }
 0x246   :  { %v778_v37 = vpop.eup %777  ;;  %v636_v2 = vpop.xlane.xlu0 %635 }
 0x247   :  { %779 = vpow2.f32 %v589_v40  ;;  %v640_v38 = vsub.f32 %v534_v59, %v636_v2  ;;  %v641_v4 = vsub.f32 %v563_v61, %v636_v2  ;;  %v593_v44 = vadd.f32 %v778_v37, %v776_v1 }
 0x248   :  { %781 = vpow2.f32 %v591_v60 }
 0x249   :  { %v644_v5 = vmul.f32 1.442695, %v640_v38  ;;  %v646_v45 = vmul.f32 1.442695, %v641_v4  ;;  %594 = vadd.xlane.f32.xlu1 %v593_v44 }
 0x24b   :  { %783 = vpow2.f32 %v644_v5  ;;  %v543_v35 = vpop.f32.mrf.mxu2  ;;  %v572_v36 = vpop.f32.mrf.mxu3 }
 0x24c   :  { %785 = vpow2.f32 %v646_v45 }
 0x24d   :  { %v780_v7 = vpop.eup %779 }
 0x24e   :  { %v782_v8 = vpop.eup %781  ;;  %v639_v9 = vpop.xlane.xlu2 %638 }
 0x24f   :  { %v642_v10 = vsub.f32 %v537_v48, %v639_v9  ;;  %v643_v11 = vsub.f32 %v566_v49, %v639_v9  ;;  %v596_v12 = vadd.f32 %v782_v8, %v780_v7 }
 0x251   :  { %v784_v15 = vpop.eup %783  ;;  %v648_v21 = vmul.f32 1.442695, %v642_v10  ;;  %v650_v22 = vmul.f32 1.442695, %v643_v11  ;;  %597 = vadd.xlane.f32.xlu2 %v596_v12 }
 0x252   :  { %v786_v23 = vpop.eup %785 }
 0x253   :  { %787 = vpow2.f32 %v648_v21  ;;  %v652_v24 = vadd.f32 %v786_v23, %v784_v15 }
 0x254   :  { %789 = vpow2.f32 %v650_v22 }
 0x255   :  { %653 = vadd.xlane.f32.xlu0 %v652_v24 }
 0x259   :  { %v788_v31 = vpop.eup %787 }
 0x25a   :  { %v790_v32 = vpop.eup %789 }
 0x25b   :  { %v655_v6 = vadd.f32 %v790_v32, %v788_v31 }
 0x25d   :  { %656 = vadd.xlane.f32.xlu1 %v655_v6 }
 0x276   :  { %628 = vperm.xlu1 %771, %v774_v18  }
 0x27e   :  { %772 = vset.pattern.permute.xlu1 %v826_v3 }
 0x2bc   :  { %v595_v19 = vpop.xlane.xlu1 %594 }
 0x2bd   :  { %791 = vrcp.f32 %v595_v19 }
 0x2c3   :  { %v792_v26 = vpop.eup %791 }
 0x2c4   :  { %v598_v27 = vpop.xlane.xlu2 %597  ;;  %v601_v20 = vmul.f32 %v792_v26, %v776_v1  ;;  %v602_v52 = vmul.f32 %v792_v26, %v778_v37 }
 0x2c5   :  { %793 = vrcp.f32 %v598_v27 }
 0x2c6   :  { %v605_v53 = vmul.f32 %v601_v20, %v482_v25  ;;  %v606_v54 = vmul.f32 %v602_v52, %v511_v13 }
 0x2c8   :  { %v654_v55 = vpop.xlane.xlu0 %653  ;;  %v609_v56 = vadd.f32 %v606_v54, %v605_v53 }
 0x2c9   :  { %795 = vrcp.f32 %v654_v55 }
 0x2ca   :  { %610 = vadd.xlane.f32.xlu2 %v609_v56 }
 0x2cb   :  { %v794_v57 = vpop.eup %793 }
 0x2cc   :  { %v603_v17 = vmul.f32 %v794_v57, %v780_v7  ;;  %v604_v30 = vmul.f32 %v794_v57, %v782_v8  ;;  %v685_v8 = vand.u32 127, %v618_v42 }
 0x2ce   :  { %v607_v29 = vmul.f32 %v603_v17, %v485_v14  ;;  %v608_v59 = vmul.f32 %v604_v30, %v514_v16  ;;  %v687_v9 = vadd.s32 4294967288, %v685_v8 }
 0x2cf   :  { %v796_v61 = vpop.eup %795 }
 0x2d0   :  { %v657_v62 = vpop.xlane.xlu1 %656  ;;  %v660_v48 = vmul.f32 %v796_v61, %v784_v15  ;;  %v661_v49 = vmul.f32 %v796_v61, %v786_v23  ;;  %v612_v50 = vadd.f32 %v608_v59, %v607_v29 }
 0x2d1   :  { %797 = vrcp.f32 %v657_v62 }
 0x2d2   :  { %v664_v51 = vmul.f32 %v660_v48, %v540_v58  ;;  %v665_v63 = vmul.f32 %v661_v49, %v569_v28  ;;  %613 = vadd.xlane.f32.xlu0 %v612_v50 }
 0x2d4   :  { %v668_v33 = vadd.f32 %v665_v63, %v664_v51 }
 0x2d6   :  { %669 = vadd.xlane.f32.xlu1 %v668_v33 }
 0x2d7   :  { %v798_v34 = vpop.eup %797 }
 0x2d8   :  { %v662_v41 = vmul.f32 %v798_v34, %v788_v31  ;;  %v663_v43 = vmul.f32 %v798_v34, %v790_v32 }
 0x2da   :  { %v666_v46 = vmul.f32 %v662_v41, %v543_v35  ;;  %v667_v47 = vmul.f32 %v663_v43, %v572_v36 }
 0x2dc   :  { %v671_v0 = vadd.f32 %v667_v47, %v666_v46 }
 0x2de   :  { %672 = vadd.xlane.f32.xlu2 %v671_v0 }
 0x2e6   :  { %622 = vperm.xlu0 %770, %v774_v18  }
 0x2e8   :  { %v629_v39 = vpop.permute.xlu1 %628 }
 0x2ee   :  { %773 = vset.pattern.permute.xlu0 %v826_v3 }
 0x33d   :  { %v611_v60 = vpop.xlane.xlu2 %610 }
 0x345   :  { %v614_v1 = vpop.xlane.xlu0 %613 }
 0x346   :  { %v633_v40 = vadd.f32 %v629_v39, %v614_v1 }
 0x348   :  { %682 = vperm.xlu1 %772, %v633_v40  }
 0x349   :  { %v670_v44 = vpop.xlane.xlu1 %669 }
 0x351   :  { %v673_v37 = vpop.xlane.xlu2 %672 }
 0x352   :  { %v675_v2 = vadd.f32 %v673_v37, %v629_v39 }
 0x354   :  { %698 = vperm.xlu1 %772, %v675_v2  }
 0x358   :  { %v623_v38 = vpop.permute.xlu0 %622 }
 0x359   :  { %v632_v4 = vadd.f32 %v623_v38, %v611_v60  ;;  %v674_v5 = vadd.f32 %v670_v44, %v623_v38 }
 0x35b   :  { %679 = vperm.xlu2 %769, %v632_v4  }
 0x363   :  { %695 = vperm.xlu2 %769, %v674_v5  }
 0x3b5   :  { %v680_v45 = vpop.permute.xlu2 %679 }
 0x3b6   :  { %v686_v12 = vperm.slane %v680_v45, %v685_v8 }
 0x3ba   :  { %v683_v7 = vpop.permute.xlu1 %682 }
 0x3bb   :  { %v688_v10 = vperm.slane %v683_v7, %v687_v9 }
 0x3bd   :  { %v696_v3 = vpop.permute.xlu2 %695  ;;  %v690_v22 = vsel %vm689_vm1, %v688_v10, %v686_v12 }
 0x3be   :  { %v700_v15 = vperm.slane %v696_v3, %v685_v8 }
 0x3c6   :  { %v699_v11 = vpop.permute.xlu1 %698 }
 0x3c7   :  { %v701_v21 = vperm.slane %v699_v11, %v687_v9 }
 0x3c9   :  { %v702_v23 = vsel %vm689_vm1, %v701_v21, %v700_v15 }
 0x3ca   :  { %v705_v42 = vsel %vm704_vm2, %v690_v22, %v702_v23 }
 0x3cb   :  { %707 = vst.msk [vmem:[#allocation2] sm:$0x3] %vm706_vm3, %v705_v42 }
 0x3cc   :  { %718 = dma.vmem_to_hbm [thread:$0]  %s714_s17, 32, %s716_s3, [#allocation3]  }
 0x3cd   :  { %823 = dma.done.wait [#allocation3], 32  }
 0x3ce   :  { %824 = vsyncadd [#allocation3], 4294967264 }
 0x3cf   :  { %723 = vsyncpa [#allocation3], 1 }

</bundles_post_ra>
